<compile_context>
chip_gen: v7x
topology: tpu7x:2x2x1
jax: 0.10.0
libtpu: 0.0.40
codegen_flags: <defaults>
</compile_context>

<pallas_src>
import functools

import jax
import jax.numpy as jnp
from jax.experimental import pallas as pl
from jax.experimental.pallas import tpu as pltpu


def _round_up(x, m):
    return ((x + m - 1) // m) * m


def _silu(x):
    # Plain SiLU; the 0.909 LipSwish scale has been folded into the next
    # layer's weights by the wrapper.
    return x * jax.nn.sigmoid(x)


def _disc_mlp_kernel(t_ref, h_ref, w1t_ref, w1h_ref, b1_ref,
                     w2_ref, b2_ref, w3_ref, b3_ref, out_ref):
    """Full MLP forward for one batch tile, entirely in VMEM.

    t_ref  : (1, 1)              f32  (SMEM scalar time)
    h_ref  : (TB, hidden)        f32
    w1t_ref: (1, mlp)            f32  (time row of W1)
    w1h_ref: (hidden, mlp)       f32  b1_ref: (1, mlp)
    w2_ref : (mlp, mlp)          f32  b2_ref: (1, mlp)   (0.909 pre-folded)
    w3_ref : (mlp, out_pad)      f32  b3_ref: (1, out_pad) (0.909 pre-folded)
    out_ref: (TB, out_pad)       f32  where out_pad = roundup(hidden*(1+data), 128)
    """
    t = t_ref[0, 0]
    x = h_ref[...]

    # Layer 1: fold time into the bias -> K = hidden (aligned), no concat.
    bias1 = t * w1t_ref[...] + b1_ref[...]
    z = jnp.dot(x, w1h_ref[...], preferred_element_type=jnp.float32) + bias1
    a = _silu(z)

    # Layer 2 (num_layers - 1 == 1 hidden layer here).
    z = jnp.dot(a, w2_ref[...], preferred_element_type=jnp.float32) + b2_ref[...]
    a = _silu(z)

    # Output layer + Tanh.
    z = jnp.dot(a, w3_ref[...], preferred_element_type=jnp.float32) + b3_ref[...]
    out_ref[...] = jnp.tanh(z)


@functools.partial(jax.jit,
                   static_argnames=("data_size", "hidden_size", "block_batch"))
def discriminator_func_forward(t, h, params, *, data_size, hidden_size,
                               block_batch=256):
    """JAX wrapper mirroring DiscriminatorFunc.forward(t, h)."""
    batch = h.shape[0]
    mlp_size = params[0].shape[1]
    out_features = hidden_size * (1 + data_size)
    out_pad = _round_up(out_features, 128)          # lane-dense output stores

    w1, b1, w2, b2, w3, b3 = params                 # w1: (1 + hidden, mlp)

    # Split W1 into its time row and h block; fold LipSwish's 0.909 scale
    # into the weights that consume each LipSwish output.
    w1_t = w1[0:1, :]                               # (1, mlp)
    w1_h = w1[1:, :]                                # (hidden, mlp)
    w2_s = 0.909 * w2
    w3_s = 0.909 * w3

    # Pad the final layer so the kernel output's last dim is a multiple of 128.
    if out_pad != out_features:
        w3_s = jnp.pad(w3_s, ((0, 0), (0, out_pad - out_features)))
        b3_p = jnp.pad(b3, ((0, 0), (0, out_pad - out_features)))
    else:
        b3_p = b3

    # Batch tiling: tile divisible by 8 (sublanes), padded batch divides evenly.
    tb = min(block_batch, _round_up(batch, 8))
    b_pad = _round_up(batch, tb)
    h_p = h if b_pad == batch else jnp.pad(h, ((0, b_pad - batch), (0, 0)))

    t_arr = jnp.asarray(t, jnp.float32).reshape(1, 1)

    grid = (b_pad // tb,)
    const = lambda i: (0, 0)                        # weights stay VMEM-resident

    out = pl.pallas_call(
        _disc_mlp_kernel,
        out_shape=jax.ShapeDtypeStruct((b_pad, out_pad), jnp.float32),
        grid=grid,
        in_specs=[
            pl.BlockSpec(memory_space=pltpu.MemorySpace.SMEM),     # t (1,1)
            pl.BlockSpec((tb, hidden_size), lambda i: (i, 0)),     # h tile
            pl.BlockSpec((1, mlp_size), const),                    # w1_t
            pl.BlockSpec((hidden_size, mlp_size), const),          # w1_h
            pl.BlockSpec((1, mlp_size), const),                    # b1
            pl.BlockSpec((mlp_size, mlp_size), const),             # w2 (scaled)
            pl.BlockSpec((1, mlp_size), const),                    # b2
            pl.BlockSpec((mlp_size, out_pad), const),              # w3 (scaled, padded)
            pl.BlockSpec((1, out_pad), const),                     # b3 (padded)
        ],
        out_specs=pl.BlockSpec((tb, out_pad), lambda i: (i, 0)),
        compiler_params=pltpu.CompilerParams(
            dimension_semantics=("parallel",)),                    # megacore on v7x
    )(t_arr, h_p, w1_t, w1_h, b1, w2_s, b2, w3_s, b3_p)

    out = out[:batch, :out_features]
    return out.reshape(batch, hidden_size, 1 + data_size)


def init_params(key, data_size, hidden_size, mlp_size):
    """Deterministic PyTorch-Linear-style init (uniform +/- 1/sqrt(fan_in)).

    Weights are stored as (in_features, out_features) == torch weight.T
    so the kernel can do y = x @ W + b.
    """
    in_size = 1 + hidden_size
    out_size = hidden_size * (1 + data_size)

    def linear(k, fan_in, fan_out):
        kw, kb = jax.random.split(k)
        bound = 1.0 / jnp.sqrt(jnp.asarray(fan_in, jnp.float32))
        w = jax.random.uniform(kw, (fan_in, fan_out), jnp.float32, -bound, bound)
        b = jax.random.uniform(kb, (1, fan_out), jnp.float32, -bound, bound)
        return w, b

    k1, k2, k3 = jax.random.split(key, 3)
    w1, b1 = linear(k1, in_size, mlp_size)
    w2, b2 = linear(k2, mlp_size, mlp_size)
    w3, b3 = linear(k3, mlp_size, out_size)
    return (w1, b1, w2, b2, w3, b3)


def _reference_forward(t, h, params, data_size, hidden_size):
    """Pure-JAX reference (original un-folded math) for a correctness check."""
    w1, b1, w2, b2, w3, b3 = params
    batch = h.shape[0]
    t_col = jnp.broadcast_to(jnp.asarray(t, h.dtype).reshape(1, 1), (batch, 1))
    x = jnp.concatenate([t_col, h], axis=1)
    lipswish = lambda z: 0.909 * z * jax.nn.sigmoid(z)
    x = lipswish(x @ w1 + b1)
    x = lipswish(x @ w2 + b2)
    x = jnp.tanh(x @ w3 + b3)
    return x.reshape(batch, hidden_size, 1 + data_size)


if __name__ == "__main__":
    key = jax.random.PRNGKey(0)

    # Case 1: shapes consistent with the module defaults.
    #   data_size=3, hidden_size=32, mlp_size=32, num_layers=2, batch=8
    #   (out_features = 32 * 4 = 128, already lane-dense)
    data_size, hidden_size, mlp_size, batch = 3, 32, 32, 8
    k_params, k_h, k_t, key = jax.random.split(key, 4)
    params = init_params(k_params, data_size, hidden_size, mlp_size)
    h = jax.random.normal(k_h, (batch, hidden_size), jnp.float32)
    t = jax.random.uniform(k_t, (), jnp.float32)

    out = discriminator_func_forward(
        t, h, params, data_size=data_size, hidden_size=hidden_size)
    out = jax.block_until_ready(out)
    ref = _reference_forward(t, h, params, data_size, hidden_size)
    assert out.shape == (batch, hidden_size, 1 + data_size)
    assert jnp.allclose(out, ref, atol=1e-5, rtol=1e-5)

    # Case 2: exercises batch padding and output-lane padding (out = 96 -> 128).
    data_size2, hidden_size2, mlp_size2, batch2 = 2, 32, 32, 20
    k_params2, k_h2, k_t2, key = jax.random.split(key, 4)
    params2 = init_params(k_params2, data_size2, hidden_size2, mlp_size2)
    h2 = jax.random.normal(k_h2, (batch2, hidden_size2), jnp.float32)
    t2 = jax.random.uniform(k_t2, (), jnp.float32)

    out2 = discriminator_func_forward(
        t2, h2, params2, data_size=data_size2, hidden_size=hidden_size2)
    out2 = jax.block_until_ready(out2)
    ref2 = _reference_forward(t2, h2, params2, data_size2, hidden_size2)
    assert out2.shape == (batch2, hidden_size2, 1 + data_size2)
    assert jnp.allclose(out2, ref2, atol=1e-5, rtol=1e-5)

    print("KERNEL_OK")
</pallas_src>

<mosaic_0001>
module attributes {stable_mosaic.version = 11 : i64} {
  func.func @_disc_mlp_kernel(%arg0: i32, %arg1: memref<1x1xf32, #tpu.memory_space<smem>>, %arg2: memref<8x32xf32, #tpu.memory_space<vmem>>, %arg3: memref<1x32xf32, #tpu.memory_space<vmem>>, %arg4: memref<32x32xf32, #tpu.memory_space<vmem>>, %arg5: memref<1x32xf32, #tpu.memory_space<vmem>>, %arg6: memref<32x32xf32, #tpu.memory_space<vmem>>, %arg7: memref<1x32xf32, #tpu.memory_space<vmem>>, %arg8: memref<32x128xf32, #tpu.memory_space<vmem>>, %arg9: memref<1x128xf32, #tpu.memory_space<vmem>>, %arg10: memref<8x128xf32, #tpu.memory_space<vmem>>) attributes {dimension_semantics = [#tpu.dimension_semantics<parallel>], iteration_bounds = array<i64: 1>, scalar_prefetch = 0 : i64, scratch_operands = 0 : i64, tpu.core_type = #tpu.core_type<tc>, window_params = [{transform_indices = @transform_0, window_bounds = array<i64: 1, 1>}, {transform_indices = @transform_1, window_bounds = array<i64: 8, 32>}, {pipeline_mode = #tpu.pipeline_mode<synchronous>, transform_indices = @transform_2, window_bounds = array<i64: 1, 32>}, {pipeline_mode = #tpu.pipeline_mode<synchronous>, transform_indices = @transform_3, window_bounds = array<i64: 32, 32>}, {pipeline_mode = #tpu.pipeline_mode<synchronous>, transform_indices = @transform_4, window_bounds = array<i64: 1, 32>}, {pipeline_mode = #tpu.pipeline_mode<synchronous>, transform_indices = @transform_5, window_bounds = array<i64: 32, 32>}, {pipeline_mode = #tpu.pipeline_mode<synchronous>, transform_indices = @transform_6, window_bounds = array<i64: 1, 32>}, {pipeline_mode = #tpu.pipeline_mode<synchronous>, transform_indices = @transform_7, window_bounds = array<i64: 32, 128>}, {pipeline_mode = #tpu.pipeline_mode<synchronous>, transform_indices = @transform_8, window_bounds = array<i64: 1, 128>}, {transform_indices = @transform_9, window_bounds = array<i64: 8, 128>}]} {
    %c0 = arith.constant 0 : index
    %c0_0 = arith.constant 0 : index
    %0 = memref.load %arg1[%c0, %c0_0] : memref<1x1xf32, #tpu.memory_space<smem>>
    %c0_1 = arith.constant 0 : index
    %c0_2 = arith.constant 0 : index
    %1 = vector.load %arg2[%c0_1, %c0_2] : memref<8x32xf32, #tpu.memory_space<vmem>>, vector<8x32xf32>
    %c0_3 = arith.constant 0 : index
    %c0_4 = arith.constant 0 : index
    %2 = vector.load %arg3[%c0_3, %c0_4] : memref<1x32xf32, #tpu.memory_space<vmem>>, vector<1x32xf32>
    %3 = vector.broadcast %0 : f32 to vector<1x32xf32>
    %4 = arith.mulf %3, %2 : vector<1x32xf32>
    %c0_5 = arith.constant 0 : index
    %c0_6 = arith.constant 0 : index
    %5 = vector.load %arg5[%c0_5, %c0_6] : memref<1x32xf32, #tpu.memory_space<vmem>>, vector<1x32xf32>
    %6 = arith.addf %4, %5 : vector<1x32xf32>
    %c0_7 = arith.constant 0 : index
    %c0_8 = arith.constant 0 : index
    %7 = vector.load %arg4[%c0_7, %c0_8] : memref<32x32xf32, #tpu.memory_space<vmem>>, vector<32x32xf32>
    %cst = arith.constant dense<0.000000e+00> : vector<8x32xf32>
    %8 = tpu.matmul %1, %7, %cst {dimension_numbers = #tpu.dot_dimension_numbers<[1], [0], [0], [1], [0, 0, 1, 1], [], []>} : vector<8x32xf32>, vector<32x32xf32>, vector<8x32xf32> -> vector<8x32xf32>
    %9 = vector.broadcast %6 : vector<1x32xf32> to vector<8x32xf32>
    %10 = arith.addf %8, %9 : vector<8x32xf32>
    %11 = arith.negf %10 : vector<8x32xf32>
    %12 = math.exp %11 : vector<8x32xf32>
    %cst_9 = arith.constant 1.000000e+00 : f32
    %13 = vector.broadcast %cst_9 : f32 to vector<8x32xf32>
    %14 = arith.addf %13, %12 : vector<8x32xf32>
    %15 = arith.divf %13, %14 : vector<8x32xf32>
    %16 = arith.mulf %10, %15 : vector<8x32xf32>
    %c0_10 = arith.constant 0 : index
    %c0_11 = arith.constant 0 : index
    %17 = vector.load %arg6[%c0_10, %c0_11] : memref<32x32xf32, #tpu.memory_space<vmem>>, vector<32x32xf32>
    %cst_12 = arith.constant dense<0.000000e+00> : vector<8x32xf32>
    %18 = tpu.matmul %16, %17, %cst_12 {dimension_numbers = #tpu.dot_dimension_numbers<[1], [0], [0], [1], [0, 0, 1, 1], [], []>} : vector<8x32xf32>, vector<32x32xf32>, vector<8x32xf32> -> vector<8x32xf32>
    %c0_13 = arith.constant 0 : index
    %c0_14 = arith.constant 0 : index
    %19 = vector.load %arg7[%c0_13, %c0_14] : memref<1x32xf32, #tpu.memory_space<vmem>>, vector<1x32xf32>
    %20 = vector.broadcast %19 : vector<1x32xf32> to vector<8x32xf32>
    %21 = arith.addf %18, %20 : vector<8x32xf32>
    %22 = arith.negf %21 : vector<8x32xf32>
    %23 = math.exp %22 : vector<8x32xf32>
    %cst_15 = arith.constant 1.000000e+00 : f32
    %24 = vector.broadcast %cst_15 : f32 to vector<8x32xf32>
    %25 = arith.addf %24, %23 : vector<8x32xf32>
    %26 = arith.divf %24, %25 : vector<8x32xf32>
    %27 = arith.mulf %21, %26 : vector<8x32xf32>
    %c0_16 = arith.constant 0 : index
    %c0_17 = arith.constant 0 : index
    %28 = vector.load %arg8[%c0_16, %c0_17] : memref<32x128xf32, #tpu.memory_space<vmem>>, vector<32x128xf32>
    %cst_18 = arith.constant dense<0.000000e+00> : vector<8x128xf32>
    %29 = tpu.matmul %27, %28, %cst_18 {dimension_numbers = #tpu.dot_dimension_numbers<[1], [0], [0], [1], [0, 0, 1, 1], [], []>} : vector<8x32xf32>, vector<32x128xf32>, vector<8x128xf32> -> vector<8x128xf32>
    %c0_19 = arith.constant 0 : index
    %c0_20 = arith.constant 0 : index
    %30 = vector.load %arg9[%c0_19, %c0_20] : memref<1x128xf32, #tpu.memory_space<vmem>>, vector<1x128xf32>
    %31 = vector.broadcast %30 : vector<1x128xf32> to vector<8x128xf32>
    %32 = arith.addf %29, %31 : vector<8x128xf32>
    %33 = math.tanh %32 : vector<8x128xf32>
    %c0_21 = arith.constant 0 : index
    %c0_22 = arith.constant 0 : index
    %34 = vector.load %arg10[%c0_21, %c0_22] : memref<8x128xf32, #tpu.memory_space<vmem>>, vector<8x128xf32>
    tpu.vector_store %arg10[%c0_21, %c0_22], %33 {strides = array<i32>} : memref<8x128xf32, #tpu.memory_space<vmem>>, vector<8x128xf32>,
    return
  }
  func.func @transform_0(%arg0: i32) -> (i32, i32) {
    %c0_i32 = arith.constant 0 : i32
    %c0_i32_0 = arith.constant 0 : i32
    %c0_i32_1 = arith.constant 0 : i32
    return %c0_i32, %c0_i32_0 : i32, i32
  }
  func.func @transform_1(%arg0: i32) -> (i32, i32) {
    %c0_i32 = arith.constant 0 : i32
    %c0_i32_0 = arith.constant 0 : i32
    return %arg0, %c0_i32 : i32, i32
  }
  func.func @transform_2(%arg0: i32) -> (i32, i32) {
    %c0_i32 = arith.constant 0 : i32
    %c0_i32_0 = arith.constant 0 : i32
    %c0_i32_1 = arith.constant 0 : i32
    return %c0_i32, %c0_i32_0 : i32, i32
  }
  func.func @transform_3(%arg0: i32) -> (i32, i32) {
    %c0_i32 = arith.constant 0 : i32
    %c0_i32_0 = arith.constant 0 : i32
    %c0_i32_1 = arith.constant 0 : i32
    return %c0_i32, %c0_i32_0 : i32, i32
  }
  func.func @transform_4(%arg0: i32) -> (i32, i32) {
    %c0_i32 = arith.constant 0 : i32
    %c0_i32_0 = arith.constant 0 : i32
    %c0_i32_1 = arith.constant 0 : i32
    return %c0_i32, %c0_i32_0 : i32, i32
  }
  func.func @transform_5(%arg0: i32) -> (i32, i32) {
    %c0_i32 = arith.constant 0 : i32
    %c0_i32_0 = arith.constant 0 : i32
    %c0_i32_1 = arith.constant 0 : i32
    return %c0_i32, %c0_i32_0 : i32, i32
  }
  func.func @transform_6(%arg0: i32) -> (i32, i32) {
    %c0_i32 = arith.constant 0 : i32
    %c0_i32_0 = arith.constant 0 : i32
    %c0_i32_1 = arith.constant 0 : i32
    return %c0_i32, %c0_i32_0 : i32, i32
  }
  func.func @transform_7(%arg0: i32) -> (i32, i32) {
    %c0_i32 = arith.constant 0 : i32
    %c0_i32_0 = arith.constant 0 : i32
    %c0_i32_1 = arith.constant 0 : i32
    return %c0_i32, %c0_i32_0 : i32, i32
  }
  func.func @transform_8(%arg0: i32) -> (i32, i32) {
    %c0_i32 = arith.constant 0 : i32
    %c0_i32_0 = arith.constant 0 : i32
    %c0_i32_1 = arith.constant 0 : i32
    return %c0_i32, %c0_i32_0 : i32, i32
  }
  func.func @transform_9(%arg0: i32) -> (i32, i32) {
    %c0_i32 = arith.constant 0 : i32
    %c0_i32_0 = arith.constant 0 : i32
    return %arg0, %c0_i32 : i32, i32
  }
}

</mosaic_0001>

<bundles_post_ra>
// kernel: discriminator_func_forward.1
= control target key start
LH: loop header
LB: loop body
LE: loop exit
PB: predicated region body
PF: predicated region fallthrough
CT: control target
= control target key end

     0   :  { %v398_v0 = vmov 0.0|0.0   ;;  %vm399_vm0 = vmmov 0   ;;  %v400_v4 = vmov 0.0   ;;  %vm50_vm1 = vcmask 261120   ;;  %s514_s3 = inlined_call_operand.vmem [shape: f32[32,32], index: 3, kind: input, shape index: {}]   ;;  %s515_s1 = inlined_call_operand.vmem [shape: f32[8,32], index: 1, kind: input, shape index: {}]   ;;  %s516_s5 = inlined_call_operand.vmem [shape: f32[32,32], index: 5, kind: input, shape index: {}]   ;;  %s517_s0 = inlined_call_operand.<no memory space> [shape: f32[1,1], index: 0, kind: input, shape index: {}]   ;;  %s518_s2 = inlined_call_operand.vmem [shape: f32[1,32], index: 2, kind: input, shape index: {}]   ;;  %s519_s4 = inlined_call_operand.vmem [shape: f32[1,32], index: 4, kind: input, shape index: {}]   ;;  %s520_s7 = inlined_call_operand.vmem [shape: f32[32,128], index: 7, kind: input, shape index: {}]   ;;  %s521_s6 = inlined_call_operand.vmem [shape: f32[1,32], index: 6, kind: input, shape index: {}]   ;;  %s522_s8 = inlined_call_operand.vmem [shape: f32[1,128], index: 8, kind: input, shape index: {}]   ;;  %s523_s9 = inlined_call_operand.vmem [shape: f32[8,128], index: 9, kind: output, shape index: {}]  }
   0x1   :  { %367 = vmatprep.subr.bf16.mxu0 %v398_v0  ;;  %v40_v1 = vld [vmem:[%s514_s3] sm:$0xff]  ;;  %v41_v2 = vld [vmem:[%s514_s3 + $0x8] sm:$0xff]  ;;  %v42_v3 = vld [vmem:[%s514_s3 + $0x10] sm:$0xff]  ;;  %342 = vmatprep.mubr.msk.f32.mxu0 %vm399_vm0, %v400_v4  ;;  %v45_v15 = vlaneseq  ;;  %v36_v17 = vstv %s517_s0 }
   0x2   :  { %v368_v5 = vpack.c.bf16 %v41_v2, %v40_v1  ;;  %v43_v6 = vld [vmem:[%s514_s3 + $0x18] sm:$0xff]  ;;  %373 = vmatprep.subr.bf16.mxu1 %v398_v0  ;;  %353 = vmatprep.mubr.msk.f32.mxu1 %vm399_vm0, %v400_v4  ;;  %v34_v8 = vld [vmem:[%s515_s1] sm:$0xff]  ;;  %v132_v10 = vld [vmem:[%s516_s5 + $0x8] sm:$0xff] }
   0x3   :  { %v371_v7 = vpack.c.bf16 %v43_v6, %v42_v3  ;;  %v131_v9 = vld [vmem:[%s516_s5] sm:$0xff]  ;;  %v133_v12 = vld [vmem:[%s516_s5 + $0x10] sm:$0xff]  ;;  %v134_v13 = vld [vmem:[%s516_s5 + $0x18] sm:$0xff]  ;;  %v46_v19 = vshrl.u32 %v45_v15, 7 }
   0x4   :  { %369 = vmatpush3.bf16.msra.mxu0 %v368_v5  ;;  %v374_v11 = vpack.c.bf16 %v132_v10, %v131_v9  ;;  %v377_v14 = vpack.c.bf16 %v134_v13, %v133_v12  ;;  %v35_v16 = vld [vmem:[%s518_s2] sm:$0x1]  ;;  %v223_v33 = vld [vmem:[%s520_s7 + $0x8] sm:$0xff]  ;;  %v224_v35 = vld [vmem:[%s520_s7 + $0x10] sm:$0xff] }
   0x5   :  { %370 = vmatprep.subr.bf16.mxu0 %v398_v0  ;;  %v37_v18 = vmul.f32 %v36_v17, %v35_v16  ;;  %v38_v20 = vld [vmem:[%s519_s4] sm:$0x1]  ;;  %v47_v22 = vsub.s32 0, %v46_v19  ;;  %v225_v36 = vld [vmem:[%s520_s7 + $0x18] sm:$0xff] }
   0x6   :  { %375 = vmatpush3.bf16.msra.mxu1 %v374_v11  ;;  %v222_v32 = vld [vmem:[%s520_s7] sm:$0xff]  ;;  %v383_v37 = vpack.c.bf16 %v225_v36, %v224_v35 }
   0x7   :  { %376 = vmatprep.subr.bf16.mxu1 %v398_v0  ;;  %v39_v21 = vadd.f32 %v38_v20, %v37_v18  ;;  %v380_v34 = vpack.c.bf16 %v223_v33, %v222_v32  ;;  %v314_v38 = vld [vmem:[%s521_s6] ss:$0 sm:$0xff] }
   0x8   :  { %372 = vmatpush3.bf16.msra.mxu0 %v371_v7  ;;  %v317_v47 = vld [vmem:[%s522_s8] ss:$0 sm:$0xff] }
   0x9   :  { %379 = vmatprep.subr.bf16.mxu0 %v398_v0  ;;  %v48_v23 = vrot.slane %v39_v21, %v47_v22 }
   0xa   :  { %378 = vmatpush3.bf16.msra.mxu1 %v377_v14 }
   0xb   :  { %343 = vmatmul.mubr.msk.f32.vlgmr.msra.gmra.mrb[0].mxu0 %vm50_vm1, %v34_v8 }
   0xc   :  { %364 = vmatprep.mubr.msk.f32.mxu0 %vm399_vm0, %v400_v4  ;;  %381 = vmatpush3.bf16.msra.mxu0 %v380_v34 }
   0xd   :  { %382 = vmatprep.subr.bf16.mxu0 %v398_v0 }
  0x10   :  { %384 = vmatpush3.bf16.msra.mxu0 %v383_v37 }
  0xde   :  { %v120_v24 = vpop.f32.mrb[0].mxu0 }
  0xdf   :  { %v121_v25 = vadd.f32 %v120_v24, %v48_v23  ;;  %v344_v26 = vpop.f32.mrb[1].mxu0 }
  0xe1   :  { %v313_v27 = vmul.f32 -1.442695, %v121_v25 }
  0xe3   :  { %388 = vpow2.f32 %v313_v27 }
  0xed   :  { %v389_v28 = vpop.eup %388 }
  0xee   :  { %v127_v29 = vadd.f32 1.0, %v389_v28 }
  0xf0   :  { %390 = vrcp.f32 %v127_v29 }
  0xfa   :  { %v391_v30 = vpop.eup %390 }
  0xfb   :  { %v130_v31 = vmul.f32 %v391_v30, %v121_v25 }
  0xfd   :  { %354 = vmatmul.mubr.msk.f32.vlgmr.msra.gmra.mrb[0].mxu1 %vm50_vm1, %v130_v31 }
 0x1d0   :  { %v211_v39 = vpop.f32.mrb[0].mxu1 }
 0x1d1   :  { %v212_v40 = vadd.f32 %v314_v38, %v211_v39  ;;  %v355_v41 = vpop.f32.mrb[1].mxu1 }
 0x1d3   :  { %v316_v42 = vmul.f32 -1.442695, %v212_v40 }
 0x1d5   :  { %392 = vpow2.f32 %v316_v42 }
 0x1df   :  { %v393_v43 = vpop.eup %392 }
 0x1e0   :  { %v218_v44 = vadd.f32 1.0, %v393_v43 }
 0x1e2   :  { %394 = vrcp.f32 %v218_v44 }
 0x1ec   :  { %v395_v45 = vpop.eup %394 }
 0x1ed   :  { %v221_v46 = vmul.f32 %v395_v45, %v212_v40 }
 0x1ef   :  { %365 = vmatmul.mubr.msk.f32.vlgmr.msra.gmra.mrb[2].mxu0 %vm50_vm1, %v221_v46 }
 0x2c2   :  { %v302_v48 = vpop.f32.mrb[2].mxu0 }
 0x2c3   :  { %v303_v49 = vadd.f32 %v317_v47, %v302_v48  ;;  %v366_v50 = vpop.f32.mrb[3].mxu0 }
 0x2c5   :  { %396 = vtanh.f32 %v303_v49 }
 0x2cf   :  { %v397_v51 = vpop.eup %396 }
 0x2d0   :  { %307 = vst [vmem:[%s523_s9] sm:$0xff] %v397_v51 }

</bundles_post_ra>
